<compile_context>
chip_gen: v5e
topology: v5e:2x2
jax: 0.10.0
libtpu: 0.0.40
codegen_flags: <defaults>
</compile_context>

<pallas_src>
import functools

import jax
import jax.numpy as jnp
from jax.experimental import pallas as pl
from jax.experimental.pallas import tpu as pltpu

_LANES = 128
_SUBLANES = 8
_MAX_TILE_ROWS = 2048   # (2048, 128) f32 = 1 MiB per block, 2 MiB double-buffered
_NUM_CORES = 2          # leading "parallel" grid axis (dual-TC split on v7x)
# TODO(synk): query pltpu.get_tpu_info() for the real TensorCore count instead of
# hardcoding 2 (the extra serial core-iteration on 1-TC chips is ~one grid step).


def _wgan_partial_sum_kernel(x_ref, o_ref, *, tile_rows, valid_rows,
                             blocks_per_core, needs_mask):
    """Per-core partial sum of the (rows, 128) slab into a (1, 8, 128) block."""
    core = pl.program_id(0)
    step = pl.program_id(1)

    @pl.when(step == 0)
    def _():
        o_ref[...] = jnp.zeros_like(o_ref)

    x = x_ref[...].astype(jnp.float32)  # (tile_rows, 128), cast per block

    def _accumulate(v):
        # Fold (tile_rows, 128) -> (8, 128) with pure VPU adds (the reshape
        # preserves the minor (8, 128) tile, so no VMEM copy), then add into
        # the resident per-core output block.
        o_ref[...] += v.reshape(
            tile_rows // _SUBLANES, _SUBLANES, _LANES).sum(axis=0)[None]

    if not needs_mask:
        # Grid tiles the slab exactly: no mask code is emitted at all.
        _accumulate(x)
    else:
        block_start = (core * blocks_per_core + step) * tile_rows
        fully_valid = block_start + tile_rows <= valid_rows

        @pl.when(fully_valid)
        def _():
            _accumulate(x)

        @pl.when(jnp.logical_not(fully_valid))
        def _():
            # Tail / phantom block: rows beyond the true row count hold
            # undefined data (NOT zero) -- mask them before accumulating.
            row = (jax.lax.broadcasted_iota(jnp.int32, (tile_rows, _LANES), 0)
                   + block_start)
            _accumulate(jnp.where(row < valid_rows, x, 0.0))


def _round_up(v, m):
    return ((v + m - 1) // m) * m


@functools.partial(jax.jit, static_argnames=("target_is_real",))
def wgan_loss(prediction, target_is_real: bool):
    """Pallas implementation of the WGAN loss forward pass."""
    x = prediction.reshape(-1)
    n = x.shape[0]
    sign = -1.0 if target_is_real else 1.0

    itemsize = jnp.dtype(x.dtype).itemsize
    rows = n // _LANES                  # lane-aligned prefix rows
    rem = n - rows * _LANES             # <128 leftover elements

    total = jnp.zeros((), jnp.float32)

    if rows > 0:
        x2d = (x[: rows * _LANES] if rem else x).reshape(rows, _LANES)

        # Dtype-aware row granularity: f32 packs 8 rows per vreg, bf16 16,
        # int8/fp8 32 -- keeping tiles a multiple of that lets the DMA stay in
        # the native dtype with no relayout.
        granule = _SUBLANES * max(1, 4 // itemsize)
        tile_rows = min(_MAX_TILE_ROWS,
                        _round_up(pl.cdiv(rows, _NUM_CORES), granule))
        n_blocks = pl.cdiv(rows, tile_rows)
        blocks_per_core = pl.cdiv(n_blocks, _NUM_CORES)
        # Mask only if some (core, step) block overhangs the valid rows
        # (partial tail block, or a phantom block when n_blocks is odd).
        needs_mask = (rows % tile_rows != 0) or (
            blocks_per_core * _NUM_CORES != n_blocks)

        kernel = functools.partial(
            _wgan_partial_sum_kernel,
            tile_rows=tile_rows,
            valid_rows=rows,
            blocks_per_core=blocks_per_core,
            needs_mask=needs_mask,
        )

        partials = pl.pallas_call(
            kernel,
            out_shape=jax.ShapeDtypeStruct(
                (_NUM_CORES, _SUBLANES, _LANES), jnp.float32),
            grid_spec=pltpu.PrefetchScalarGridSpec(
                num_scalar_prefetch=0,
                grid=(_NUM_CORES, blocks_per_core),
                in_specs=[pl.BlockSpec(
                    (tile_rows, _LANES),
                    # Clamp phantom block indices (odd block count) back into
                    # range; the kernel masks their contribution to zero.
                    lambda c, i: (jnp.minimum(c * blocks_per_core + i,
                                              n_blocks - 1), 0))],
                out_specs=pl.BlockSpec((1, _SUBLANES, _LANES),
                                       lambda c, i: (c, 0, 0)),
            ),
            compiler_params=pltpu.CompilerParams(
                dimension_semantics=("parallel", "arbitrary")),
            cost_estimate=pl.CostEstimate(
                flops=rows * _LANES,
                transcendentals=0,
                bytes_accessed=rows * _LANES * itemsize
                + _NUM_CORES * _SUBLANES * _LANES * 4),
        )(x2d)

        total = total + jnp.sum(partials, dtype=jnp.float32)

    if rem > 0:
        # Fold the <128-element remainder in directly (tiny jnp.sum) instead
        # of padding + rewriting the whole array before the kernel.
        total = total + jnp.sum(x[rows * _LANES:].astype(jnp.float32))

    return ((sign / float(n)) * total).astype(prediction.dtype)


if __name__ == "__main__":
    key = jax.random.PRNGKey(0)
    k1, k2, k3 = jax.random.split(key, 3)

    # Typical patch-GAN discriminator output (lane-aligned; splits exactly
    # across the two per-core partial sums, no masking).
    x = jax.random.normal(k1, (2, 4, 16, 16), dtype=jnp.float32)
    loss_real = jax.block_until_ready(wgan_loss(x, True))
    loss_fake = jax.block_until_ready(wgan_loss(x, False))
    assert jnp.allclose(loss_real, -jnp.mean(x), atol=1e-6), (loss_real, -jnp.mean(x))
    assert jnp.allclose(loss_fake, jnp.mean(x), atol=1e-6), (loss_fake, jnp.mean(x))

    # Odd size: lane-remainder folded in the wrapper + tail-row masking in kernel.
    y = jax.random.normal(k2, (3, 5, 7, 11), dtype=jnp.float32)
    ly = jax.block_until_ready(wgan_loss(y, True))
    assert jnp.allclose(ly, -jnp.mean(y), atol=1e-6), (ly, -jnp.mean(y))

    # Larger map: bigger row blocks, exact two-way core split, no masking.
    z = jax.random.normal(k3, (2, 4, 128, 160), dtype=jnp.float32)
    lz = jax.block_until_ready(wgan_loss(z, False))
    assert jnp.allclose(lz, jnp.mean(z), atol=1e-5), (lz, jnp.mean(z))

    # bf16 input: stays packed through the DMA (granule-16 tiles), f32 accumulate.
    w = jax.random.normal(k1, (2, 4, 16, 16), dtype=jnp.bfloat16)
    lw = jax.block_until_ready(wgan_loss(w, True))
    ref = -jnp.mean(w.astype(jnp.float32))
    assert jnp.allclose(lw.astype(jnp.float32), ref, atol=1e-3), (lw, ref)

    print("KERNEL_OK")
</pallas_src>

<mosaic_0001>
module attributes {stable_mosaic.version = 11 : i64} {
  func.func @_wgan_partial_sum_kernel(%arg0: i32, %arg1: i32, %arg2: memref<8x128xf32, #tpu.memory_space<vmem>>, %arg3: memref<1x8x128xf32, #tpu.memory_space<vmem>>) attributes {dimension_semantics = [#tpu.dimension_semantics<parallel>, #tpu.dimension_semantics<arbitrary>], iteration_bounds = array<i64: 2, 1>, scalar_prefetch = 0 : i64, scratch_operands = 0 : i64, tpu.core_type = #tpu.core_type<tc>, window_params = [{transform_indices = @transform_0, window_bounds = array<i64: 8, 128>}, {transform_indices = @transform_1, window_bounds = array<i64: 1, 8, 128>}]} {
    %c0_i32 = arith.constant 0 : i32
    %0 = arith.cmpi eq, %arg1, %c0_i32 : i32
    %1 = arith.extui %0 : i1 to i32
    %c0_i32_0 = arith.constant 0 : i32
    %2 = arith.cmpi ne, %1, %c0_i32_0 : i32
    scf.if %2 {
      %cst_8 = arith.constant 0.000000e+00 : f32
      %10 = vector.broadcast %cst_8 : f32 to vector<1x8x128xf32>
      %c0_9 = arith.constant 0 : index
      %c0_10 = arith.constant 0 : index
      %c0_11 = arith.constant 0 : index
      %11 = vector.load %arg3[%c0_9, %c0_10, %c0_11] : memref<1x8x128xf32, #tpu.memory_space<vmem>>, vector<1x8x128xf32>
      tpu.vector_store %arg3[%c0_9, %c0_10, %c0_11], %10 {strides = array<i32>} : memref<1x8x128xf32, #tpu.memory_space<vmem>>, vector<1x8x128xf32>,
    } else {
    }
    %c0 = arith.constant 0 : index
    %c0_1 = arith.constant 0 : index
    %3 = vector.load %arg2[%c0, %c0_1] : memref<8x128xf32, #tpu.memory_space<vmem>>, vector<8x128xf32>
    %c0_2 = arith.constant 0 : index
    %c0_3 = arith.constant 0 : index
    %c0_4 = arith.constant 0 : index
    %4 = vector.load %arg3[%c0_2, %c0_3, %c0_4] : memref<1x8x128xf32, #tpu.memory_space<vmem>>, vector<1x8x128xf32>
    %5 = vector.shape_cast %3 : vector<8x128xf32> to vector<1x8x128xf32>
    %cst = arith.constant dense<0.000000e+00> : vector<8x128xf32>
    %6 = vector.multi_reduction <add>, %5, %cst [0] : vector<1x8x128xf32> to vector<8x128xf32>
    %7 = vector.shape_cast %6 : vector<8x128xf32> to vector<1x8x128xf32>
    %8 = arith.addf %4, %7 : vector<1x8x128xf32>
    %c0_5 = arith.constant 0 : index
    %c0_6 = arith.constant 0 : index
    %c0_7 = arith.constant 0 : index
    %9 = vector.load %arg3[%c0_5, %c0_6, %c0_7] : memref<1x8x128xf32, #tpu.memory_space<vmem>>, vector<1x8x128xf32>
    tpu.vector_store %arg3[%c0_5, %c0_6, %c0_7], %8 {strides = array<i32>} : memref<1x8x128xf32, #tpu.memory_space<vmem>>, vector<1x8x128xf32>,
    return
  }
  func.func @transform_0(%arg0: i32, %arg1: i32) -> (i32, i32) {
    %c1_i32 = arith.constant 1 : i32
    %0 = arith.muli %arg0, %c1_i32 : i32
    %1 = arith.addi %0, %arg1 : i32
    %c1_i32_0 = arith.constant 1 : i32
    %2 = arith.minsi %1, %c1_i32_0 : i32
    %c0_i32 = arith.constant 0 : i32
    %c0_i32_1 = arith.constant 0 : i32
    return %2, %c0_i32 : i32, i32
  }
  func.func @transform_1(%arg0: i32, %arg1: i32) -> (i32, i32, i32) {
    %c0_i32 = arith.constant 0 : i32
    %c0_i32_0 = arith.constant 0 : i32
    %c0_i32_1 = arith.constant 0 : i32
    return %arg0, %c0_i32, %c0_i32_0 : i32, i32, i32
  }
}

</mosaic_0001>

<bundles_post_ra>
// kernel: wgan_loss.1
= control target key start
LH: loop header
LB: loop body
LE: loop exit
PB: predicated region body
PF: predicated region fallthrough
CT: control target
= control target key end

     0   :  { %s287_s6 = smov 0   ;;  %s269_s7 = smov 0   ;;  %s298_s0 = inlined_call_operand.vmem [shape: f32[16,128], index: 0, kind: input, shape index: {}]   ;;  %s299_s1 = inlined_call_operand.vmem [shape: f32[2,8,128], index: 1, kind: output, shape index: {}]  }
   0x1   :  { %s273_s8 = smov 0  }
   0x2 LB: > { %s23_s9 = sadd.s32 1, %s271_s7  ;;  %p220_p0 = scmp.ge.s32.totalorder %s275_s8, 1  ;;  %s275_s8 = sphi %s273_s8, %s11_s8   ;;  %s271_s7 = sphi %s269_s7, %s270_s7   ;;  %s267_s6 = sphi %s287_s6, %s300_s6  }
   0x3   : > { %p25_p1 = scmp.ge.s32.totalorder %s23_s9, 2  ;;  %p110_p2 = scmp.lt.s32.totalorder %s275_s8, 3 }
   0x5   : > { %s302_s9 = smov (%p25_p1, %s23_s9), 0  ;;  %p111_p3 = pnand %p220_p0, %p110_p2 }
   0x6   : > { %p132_p4 = scmp.lt.s32.totalorder (!%p111_p3), %s267_s6, 1 }
   0x7   : > { %114 = sbr.rel (%p111_p3) target bundleno = 19 (0x13), region = 24 }
   0xc   : > { %s304_s6 = smov (!%p132_p4, %s267_s6), 1 }
   0xd   : > { %s135_s10 = scalar_select %p132_p4, %s304_s6, 1 }
   0xe   : > { %s225_s11 = sshll.u32 %s304_s6, 3 }
   0xf   : > { %s224_s12 = sshll.u32 %s135_s10, 3  ;;  %s144_s18 = scalar_lea.vmem %s299_s1, %s225_s11 }
  0x10   : > { %s137_s15 = scalar_lea.vmem %s298_s0, %s224_s12 }
  0x11   : > { %v150_v0 = vld [vmem:[%s137_s15] sm:$0xff] }
  0x12   : > { %154 = vst [vmem:[%s144_s18] sm:$0xff] %v150_v0 }
  0x13 PF: > { %s11_s8 = sadd.s32 1, %s275_s8   ;;  %s300_s6 = smov %s271_s7 }
  0x14   : > { %p8_p5 = scmp.ge.s32.totalorder %s11_s8, 4   ;;  %s270_s7 = smov %s302_s9  }
  0x16   :  { %10 = sbr.rel (!%p8_p5) target bundleno = 2 (0x2), region = 58 }

</bundles_post_ra>
